<compile_context>
chip_gen: v7x
topology: tpu7x:2x2x1
jax: 0.10.0
libtpu: 0.0.40
codegen_flags: <defaults>
</compile_context>

<pallas_src>
import functools

import numpy as np
import jax
import jax.numpy as jnp
from jax.experimental import pallas as pl
from jax.experimental.pallas import tpu as pltpu


# --------------------------------------------------------------------------- #
# Static PyTorch-'nearest' source indices.
# --------------------------------------------------------------------------- #
def _pytorch_nearest_indices(in_size, out_size):
    # src = min(floor(dst * (in/out)), in - 1), fp32 math (PyTorch mode='nearest').
    scale = np.float32(in_size) / np.float32(out_size)
    idx = np.floor(np.arange(out_size, dtype=np.float32) * scale).astype(np.int64)
    return np.minimum(idx, in_size - 1)


# --------------------------------------------------------------------------- #
# Kernel: resize `planes` (Hin, Win) planes to (Hout, Wout).
#   x_ref   : (planes*Hin, Win)   input planes, flattened along H
#   gh_ref  : (Hout, Hin)         one-hot row (H) selection
#   gwt_ref : (Win, Wout)         one-hot column (W) selection, transposed
#   o_ref   : (planes, Hout, Wout)
# TODO(synk): the one-hot matmul gather is exact for finite inputs; NaN/Inf
# inputs would propagate through the zero terms (0*inf=NaN) unlike a true gather.
# --------------------------------------------------------------------------- #
def _nearest_resize_kernel(x_ref, gh_ref, gwt_ref, o_ref, *,
                           planes, hin, skip_h, skip_w):
    x = x_ref[...].astype(jnp.float32)                       # (planes*Hin, Win)
    if skip_w:
        cols = x                                             # Win == Wout
    else:
        # One big MXU matmul for the whole block: M = planes*Hin, K = Win, N = Wout.
        cols = jnp.dot(x, gwt_ref[...],
                       preferred_element_type=jnp.float32)   # (planes*Hin, Wout)

    if skip_h:
        for p in range(planes):                              # static, unrolled
            o_ref[p] = cols[p * hin:(p + 1) * hin, :].astype(o_ref.dtype)
    else:
        gh = gh_ref[...]
        for p in range(planes):                              # static, unrolled
            o_ref[p] = jnp.dot(gh, cols[p * hin:(p + 1) * hin, :],
                               preferred_element_type=jnp.float32).astype(o_ref.dtype)


def _choose_planes_per_step(nc, hin, win, hout, wout, itemsize):
    # Per-plane VMEM footprint: double-buffered in/out blocks + f32 cast + intermediate.
    per_plane = (2 * itemsize * (hin * win + hout * wout)
                 + 4 * hin * win + 4 * hin * wout)
    budget = 8 * 1024 * 1024          # stay well inside the default scoped-VMEM limit
    cap = 32                          # bound the static unroll
    best = None
    for tp in range(1, nc + 1):
        if nc % tp:
            continue
        # BlockSpec rule: second-to-last block dim (tp*hin) must be a multiple
        # of 8 or equal to the full array dim (tp == nc).
        if (tp * hin) % 8 != 0 and tp != nc:
            continue
        if tp <= cap and tp * per_plane <= budget:
            best = tp
    if best is None:
        best = nc                     # always-legal single-block fallback
    return best, per_plane


def interpolate_nearest(x, size, *, planes_per_step=None):
    """F.interpolate(x, size) with mode='nearest' for a 4-D NCHW tensor."""
    n, c, hin, win = x.shape
    hout, wout = int(size[0]), int(size[1])
    if (hout, wout) == (hin, win):
        return x                      # identity resize

    skip_h = hout == hin
    skip_w = wout == win

    # Static gather indices -> static one-hot selection matrices.
    h_src = _pytorch_nearest_indices(hin, hout)
    w_src = _pytorch_nearest_indices(win, wout)
    gh = jnp.asarray((h_src[:, None] == np.arange(hin)[None, :]).astype(np.float32))
    gwt = jnp.asarray((np.arange(win)[:, None] == w_src[None, :]).astype(np.float32))

    nc = n * c
    x2d = x.reshape(nc * hin, win)    # contiguity-preserving reshape, no HBM copy

    tp_auto, per_plane = _choose_planes_per_step(nc, hin, win, hout, wout,
                                                 x.dtype.itemsize)
    tp = tp_auto if planes_per_step is None else int(planes_per_step)
    assert nc % tp == 0 and ((tp * hin) % 8 == 0 or tp == nc)

    need = tp * per_plane + 4 * (hout * hin + win * wout) + (1 << 20)
    vmem_limit = int(min(need + (4 << 20), 120 << 20)) if need > (12 << 20) else None

    kernel = functools.partial(_nearest_resize_kernel, planes=tp, hin=hin,
                               skip_h=skip_h, skip_w=skip_w)
    out = pl.pallas_call(
        kernel,
        out_shape=jax.ShapeDtypeStruct((nc, hout, wout), x.dtype),
        grid_spec=pltpu.PrefetchScalarGridSpec(
            num_scalar_prefetch=0,
            grid=(nc // tp,),
            in_specs=[
                pl.BlockSpec((tp * hin, win), lambda i: (i, 0)),
                pl.BlockSpec((hout, hin), lambda i: (0, 0)),
                pl.BlockSpec((win, wout), lambda i: (0, 0)),
            ],
            out_specs=pl.BlockSpec((tp, hout, wout), lambda i: (i, 0, 0)),
        ),
        compiler_params=pltpu.CompilerParams(
            dimension_semantics=("parallel",),
            vmem_limit_bytes=vmem_limit),
    )(x2d, gh, gwt)

    return out.reshape(n, c, hout, wout)


class Interpolate:
    """Mirror of the PyTorch module: Interpolate(*shape)(x) == F.interpolate(x, shape)."""

    def __init__(self, *args):
        if len(args) == 1 and isinstance(args[0], (tuple, list)):
            args = tuple(args[0])
        self.shape = args

    def __call__(self, x):
        shape = self.shape
        if len(shape) == 1:
            shape = (int(shape[0]), int(shape[0]))
        return interpolate_nearest(x, shape)


if __name__ == "__main__":
    key = jax.random.PRNGKey(0)
    x = jax.random.normal(key, (2, 4, 16, 16), jnp.float32)

    # Upsample 16x16 -> 32x24 (PyTorch default mode='nearest').
    module = Interpolate(32, 24)
    y = module(x)
    jax.block_until_ready(y)
    assert y.shape == (2, 4, 32, 24)

    h_src = _pytorch_nearest_indices(16, 32)
    w_src = _pytorch_nearest_indices(16, 24)
    ref = x[:, :, h_src, :][:, :, :, w_src]
    assert bool(jnp.all(jnp.isfinite(y)))
    assert bool(jnp.allclose(y, ref, rtol=1e-6, atol=1e-6))

    # Downsampling case.
    y2 = interpolate_nearest(x, (8, 8))
    jax.block_until_ready(y2)
    ref2 = x[:, :, _pytorch_nearest_indices(16, 8), :][:, :, :, _pytorch_nearest_indices(16, 8)]
    assert y2.shape == (2, 4, 8, 8)
    assert bool(jnp.allclose(y2, ref2, rtol=1e-6, atol=1e-6))

    # bf16 path: dtype is preserved end-to-end; the gather is exact for bf16 values.
    xb = x.astype(jnp.bfloat16)
    yb = interpolate_nearest(xb, (32, 24))
    jax.block_until_ready(yb)
    refb = xb[:, :, h_src, :][:, :, :, w_src]
    assert yb.dtype == jnp.bfloat16
    assert bool(jnp.allclose(yb.astype(jnp.float32), refb.astype(jnp.float32),
                             rtol=1e-2, atol=1e-2))

    print("KERNEL_OK")
</pallas_src>

<mosaic_0001>
module attributes {stable_mosaic.version = 11 : i64} {
  func.func @_nearest_resize_kernel(%arg0: i32, %arg1: memref<128x16xf32, #tpu.memory_space<vmem>>, %arg2: memref<32x16xf32, #tpu.memory_space<vmem>>, %arg3: memref<16x24xf32, #tpu.memory_space<vmem>>, %arg4: memref<8x32x24xf32, #tpu.memory_space<vmem>>) attributes {dimension_semantics = [#tpu.dimension_semantics<parallel>], iteration_bounds = array<i64: 1>, scalar_prefetch = 0 : i64, scratch_operands = 0 : i64, tpu.core_type = #tpu.core_type<tc>, window_params = [{transform_indices = @transform_0, window_bounds = array<i64: 128, 16>}, {pipeline_mode = #tpu.pipeline_mode<synchronous>, transform_indices = @transform_1, window_bounds = array<i64: 32, 16>}, {pipeline_mode = #tpu.pipeline_mode<synchronous>, transform_indices = @transform_2, window_bounds = array<i64: 16, 24>}, {transform_indices = @transform_3, window_bounds = array<i64: 8, 32, 24>}]} {
    %c0 = arith.constant 0 : index
    %c0_0 = arith.constant 0 : index
    %0 = vector.load %arg1[%c0, %c0_0] : memref<128x16xf32, #tpu.memory_space<vmem>>, vector<128x16xf32>
    %c0_1 = arith.constant 0 : index
    %c0_2 = arith.constant 0 : index
    %1 = vector.load %arg3[%c0_1, %c0_2] : memref<16x24xf32, #tpu.memory_space<vmem>>, vector<16x24xf32>
    %cst = arith.constant dense<0.000000e+00> : vector<128x24xf32>
    %2 = tpu.matmul %0, %1, %cst {dimension_numbers = #tpu.dot_dimension_numbers<[1], [0], [0], [1], [0, 0, 1, 1], [], []>} : vector<128x16xf32>, vector<16x24xf32>, vector<128x24xf32> -> vector<128x24xf32>
    %c0_3 = arith.constant 0 : index
    %c0_4 = arith.constant 0 : index
    %3 = vector.load %arg2[%c0_3, %c0_4] : memref<32x16xf32, #tpu.memory_space<vmem>>, vector<32x16xf32>
    %4 = vector.extract_strided_slice %2 {offsets = [0, 0], sizes = [16, 24], strides = [1, 1]} : vector<128x24xf32> to vector<16x24xf32>
    %cst_5 = arith.constant dense<0.000000e+00> : vector<32x24xf32>
    %5 = tpu.matmul %3, %4, %cst_5 {dimension_numbers = #tpu.dot_dimension_numbers<[1], [0], [0], [1], [0, 0, 1, 1], [], []>} : vector<32x16xf32>, vector<16x24xf32>, vector<32x24xf32> -> vector<32x24xf32>
    %c0_6 = arith.constant 0 : index
    %c0_7 = arith.constant 0 : index
    %c0_8 = arith.constant 0 : index
    %6 = vector.load %arg4[%c0_6, %c0_7, %c0_8] : memref<8x32x24xf32, #tpu.memory_space<vmem>>, vector<1x32x24xf32>
    %7 = vector.shape_cast %6 : vector<1x32x24xf32> to vector<32x24xf32>
    %8 = vector.shape_cast %5 : vector<32x24xf32> to vector<1x32x24xf32>
    tpu.vector_store %arg4[%c0_6, %c0_7, %c0_8], %8 {strides = array<i32>} : memref<8x32x24xf32, #tpu.memory_space<vmem>>, vector<1x32x24xf32>,
    %9 = vector.extract_strided_slice %2 {offsets = [16, 0], sizes = [16, 24], strides = [1, 1]} : vector<128x24xf32> to vector<16x24xf32>
    %cst_9 = arith.constant dense<0.000000e+00> : vector<32x24xf32>
    %10 = tpu.matmul %3, %9, %cst_9 {dimension_numbers = #tpu.dot_dimension_numbers<[1], [0], [0], [1], [0, 0, 1, 1], [], []>} : vector<32x16xf32>, vector<16x24xf32>, vector<32x24xf32> -> vector<32x24xf32>
    %c1 = arith.constant 1 : index
    %c0_10 = arith.constant 0 : index
    %c0_11 = arith.constant 0 : index
    %11 = vector.load %arg4[%c1, %c0_10, %c0_11] : memref<8x32x24xf32, #tpu.memory_space<vmem>>, vector<1x32x24xf32>
    %12 = vector.shape_cast %11 : vector<1x32x24xf32> to vector<32x24xf32>
    %13 = vector.shape_cast %10 : vector<32x24xf32> to vector<1x32x24xf32>
    tpu.vector_store %arg4[%c1, %c0_10, %c0_11], %13 {strides = array<i32>} : memref<8x32x24xf32, #tpu.memory_space<vmem>>, vector<1x32x24xf32>,
    %14 = vector.extract_strided_slice %2 {offsets = [32, 0], sizes = [16, 24], strides = [1, 1]} : vector<128x24xf32> to vector<16x24xf32>
    %cst_12 = arith.constant dense<0.000000e+00> : vector<32x24xf32>
    %15 = tpu.matmul %3, %14, %cst_12 {dimension_numbers = #tpu.dot_dimension_numbers<[1], [0], [0], [1], [0, 0, 1, 1], [], []>} : vector<32x16xf32>, vector<16x24xf32>, vector<32x24xf32> -> vector<32x24xf32>
    %c2 = arith.constant 2 : index
    %c0_13 = arith.constant 0 : index
    %c0_14 = arith.constant 0 : index
    %16 = vector.load %arg4[%c2, %c0_13, %c0_14] : memref<8x32x24xf32, #tpu.memory_space<vmem>>, vector<1x32x24xf32>
    %17 = vector.shape_cast %16 : vector<1x32x24xf32> to vector<32x24xf32>
    %18 = vector.shape_cast %15 : vector<32x24xf32> to vector<1x32x24xf32>
    tpu.vector_store %arg4[%c2, %c0_13, %c0_14], %18 {strides = array<i32>} : memref<8x32x24xf32, #tpu.memory_space<vmem>>, vector<1x32x24xf32>,
    %19 = vector.extract_strided_slice %2 {offsets = [48, 0], sizes = [16, 24], strides = [1, 1]} : vector<128x24xf32> to vector<16x24xf32>
    %cst_15 = arith.constant dense<0.000000e+00> : vector<32x24xf32>
    %20 = tpu.matmul %3, %19, %cst_15 {dimension_numbers = #tpu.dot_dimension_numbers<[1], [0], [0], [1], [0, 0, 1, 1], [], []>} : vector<32x16xf32>, vector<16x24xf32>, vector<32x24xf32> -> vector<32x24xf32>
    %c3 = arith.constant 3 : index
    %c0_16 = arith.constant 0 : index
    %c0_17 = arith.constant 0 : index
    %21 = vector.load %arg4[%c3, %c0_16, %c0_17] : memref<8x32x24xf32, #tpu.memory_space<vmem>>, vector<1x32x24xf32>
    %22 = vector.shape_cast %21 : vector<1x32x24xf32> to vector<32x24xf32>
    %23 = vector.shape_cast %20 : vector<32x24xf32> to vector<1x32x24xf32>
    tpu.vector_store %arg4[%c3, %c0_16, %c0_17], %23 {strides = array<i32>} : memref<8x32x24xf32, #tpu.memory_space<vmem>>, vector<1x32x24xf32>,
    %24 = vector.extract_strided_slice %2 {offsets = [64, 0], sizes = [16, 24], strides = [1, 1]} : vector<128x24xf32> to vector<16x24xf32>
    %cst_18 = arith.constant dense<0.000000e+00> : vector<32x24xf32>
    %25 = tpu.matmul %3, %24, %cst_18 {dimension_numbers = #tpu.dot_dimension_numbers<[1], [0], [0], [1], [0, 0, 1, 1], [], []>} : vector<32x16xf32>, vector<16x24xf32>, vector<32x24xf32> -> vector<32x24xf32>
    %c4 = arith.constant 4 : index
    %c0_19 = arith.constant 0 : index
    %c0_20 = arith.constant 0 : index
    %26 = vector.load %arg4[%c4, %c0_19, %c0_20] : memref<8x32x24xf32, #tpu.memory_space<vmem>>, vector<1x32x24xf32>
    %27 = vector.shape_cast %26 : vector<1x32x24xf32> to vector<32x24xf32>
    %28 = vector.shape_cast %25 : vector<32x24xf32> to vector<1x32x24xf32>
    tpu.vector_store %arg4[%c4, %c0_19, %c0_20], %28 {strides = array<i32>} : memref<8x32x24xf32, #tpu.memory_space<vmem>>, vector<1x32x24xf32>,
    %29 = vector.extract_strided_slice %2 {offsets = [80, 0], sizes = [16, 24], strides = [1, 1]} : vector<128x24xf32> to vector<16x24xf32>
    %cst_21 = arith.constant dense<0.000000e+00> : vector<32x24xf32>
    %30 = tpu.matmul %3, %29, %cst_21 {dimension_numbers = #tpu.dot_dimension_numbers<[1], [0], [0], [1], [0, 0, 1, 1], [], []>} : vector<32x16xf32>, vector<16x24xf32>, vector<32x24xf32> -> vector<32x24xf32>
    %c5 = arith.constant 5 : index
    %c0_22 = arith.constant 0 : index
    %c0_23 = arith.constant 0 : index
    %31 = vector.load %arg4[%c5, %c0_22, %c0_23] : memref<8x32x24xf32, #tpu.memory_space<vmem>>, vector<1x32x24xf32>
    %32 = vector.shape_cast %31 : vector<1x32x24xf32> to vector<32x24xf32>
    %33 = vector.shape_cast %30 : vector<32x24xf32> to vector<1x32x24xf32>
    tpu.vector_store %arg4[%c5, %c0_22, %c0_23], %33 {strides = array<i32>} : memref<8x32x24xf32, #tpu.memory_space<vmem>>, vector<1x32x24xf32>,
    %34 = vector.extract_strided_slice %2 {offsets = [96, 0], sizes = [16, 24], strides = [1, 1]} : vector<128x24xf32> to vector<16x24xf32>
    %cst_24 = arith.constant dense<0.000000e+00> : vector<32x24xf32>
    %35 = tpu.matmul %3, %34, %cst_24 {dimension_numbers = #tpu.dot_dimension_numbers<[1], [0], [0], [1], [0, 0, 1, 1], [], []>} : vector<32x16xf32>, vector<16x24xf32>, vector<32x24xf32> -> vector<32x24xf32>
    %c6 = arith.constant 6 : index
    %c0_25 = arith.constant 0 : index
    %c0_26 = arith.constant 0 : index
    %36 = vector.load %arg4[%c6, %c0_25, %c0_26] : memref<8x32x24xf32, #tpu.memory_space<vmem>>, vector<1x32x24xf32>
    %37 = vector.shape_cast %36 : vector<1x32x24xf32> to vector<32x24xf32>
    %38 = vector.shape_cast %35 : vector<32x24xf32> to vector<1x32x24xf32>
    tpu.vector_store %arg4[%c6, %c0_25, %c0_26], %38 {strides = array<i32>} : memref<8x32x24xf32, #tpu.memory_space<vmem>>, vector<1x32x24xf32>,
    %39 = vector.extract_strided_slice %2 {offsets = [112, 0], sizes = [16, 24], strides = [1, 1]} : vector<128x24xf32> to vector<16x24xf32>
    %cst_27 = arith.constant dense<0.000000e+00> : vector<32x24xf32>
    %40 = tpu.matmul %3, %39, %cst_27 {dimension_numbers = #tpu.dot_dimension_numbers<[1], [0], [0], [1], [0, 0, 1, 1], [], []>} : vector<32x16xf32>, vector<16x24xf32>, vector<32x24xf32> -> vector<32x24xf32>
    %c7 = arith.constant 7 : index
    %c0_28 = arith.constant 0 : index
    %c0_29 = arith.constant 0 : index
    %41 = vector.load %arg4[%c7, %c0_28, %c0_29] : memref<8x32x24xf32, #tpu.memory_space<vmem>>, vector<1x32x24xf32>
    %42 = vector.shape_cast %41 : vector<1x32x24xf32> to vector<32x24xf32>
    %43 = vector.shape_cast %40 : vector<32x24xf32> to vector<1x32x24xf32>
    tpu.vector_store %arg4[%c7, %c0_28, %c0_29], %43 {strides = array<i32>} : memref<8x32x24xf32, #tpu.memory_space<vmem>>, vector<1x32x24xf32>,
    return
  }
  func.func @transform_0(%arg0: i32) -> (i32, i32) {
    %c0_i32 = arith.constant 0 : i32
    %c0_i32_0 = arith.constant 0 : i32
    return %arg0, %c0_i32 : i32, i32
  }
  func.func @transform_1(%arg0: i32) -> (i32, i32) {
    %c0_i32 = arith.constant 0 : i32
    %c0_i32_0 = arith.constant 0 : i32
    %c0_i32_1 = arith.constant 0 : i32
    return %c0_i32, %c0_i32_0 : i32, i32
  }
  func.func @transform_2(%arg0: i32) -> (i32, i32) {
    %c0_i32 = arith.constant 0 : i32
    %c0_i32_0 = arith.constant 0 : i32
    %c0_i32_1 = arith.constant 0 : i32
    return %c0_i32, %c0_i32_0 : i32, i32
  }
  func.func @transform_3(%arg0: i32) -> (i32, i32, i32) {
    %c0_i32 = arith.constant 0 : i32
    %c0_i32_0 = arith.constant 0 : i32
    %c0_i32_1 = arith.constant 0 : i32
    return %arg0, %c0_i32, %c0_i32_0 : i32, i32, i32
  }
}

</mosaic_0001>

<bundles_post_ra>
// kernel: tpu_custom_call.1
= control target key start
LH: loop header
LB: loop body
LE: loop exit
PB: predicated region body
PF: predicated region fallthrough
CT: control target
= control target key end

     0   :  { %vm32_vm0 = vcmask 130048   ;;  %vm327_vm1 = vcmask 195584   ;;  %s1534_s2 = inlined_call_operand.vmem [shape: f32[16,24], index: 2, kind: input, shape index: {}]   ;;  %s1535_s0 = inlined_call_operand.vmem [shape: f32[128,16], index: 0, kind: input, shape index: {}]   ;;  %s1536_s1 = inlined_call_operand.vmem [shape: f32[32,16], index: 1, kind: input, shape index: {}]   ;;  %s1537_s3 = inlined_call_operand.vmem [shape: f32[8,32,24], index: 3, kind: output, shape index: {}]  }
   0x1   :  { %v30_v0 = vld [vmem:[%s1534_s2] sm:$0xff]  ;;  %v31_v1 = vld [vmem:[%s1534_s2 + $0x8] sm:$0xff]  ;;  %v16_v5 = vld [vmem:[%s1535_s0 + $0x10] sm:$0xff] }
   0x2   :  { %v14_v2 = vld [vmem:[%s1535_s0] sm:$0xff]  ;;  %v1216_v3 = vpack.c.bf16 %v31_v1, %v30_v0  ;;  %v15_v4 = vld [vmem:[%s1535_s0 + $0x8] sm:$0xff]  ;;  %v17_v6 = vld [vmem:[%s1535_s0 + $0x18] sm:$0xff] }
   0x3   :  { %1112 = vmatprep.mubr.msk.f32.mxu0 %vm32_vm0, %v14_v2  ;;  %v18_v7 = vld [vmem:[%s1535_s0 + $0x20] sm:$0xff]  ;;  %v19_v8 = vld [vmem:[%s1535_s0 + $0x28] sm:$0xff]  ;;  %v20_v9 = vld [vmem:[%s1535_s0 + $0x30] sm:$0xff] }
   0x4   :  { %1217 = vmatprep.subr.bf16.mxu0 %v1216_v3  ;;  %v21_v10 = vld [vmem:[%s1535_s0 + $0x38] sm:$0xff]  ;;  %v22_v11 = vld [vmem:[%s1535_s0 + $0x40] sm:$0xff]  ;;  %v23_v12 = vld [vmem:[%s1535_s0 + $0x48] sm:$0xff] }
   0x5   :  { %1219 = vmatpush3.bf16.msra.mxu0 %v1216_v3  ;;  %v24_v13 = vld [vmem:[%s1535_s0 + $0x50] sm:$0xff]  ;;  %v25_v14 = vld [vmem:[%s1535_s0 + $0x58] sm:$0xff]  ;;  %v26_v15 = vld [vmem:[%s1535_s0 + $0x60] sm:$0xff] }
   0x6   :  { %v27_v16 = vld [vmem:[%s1535_s0 + $0x68] sm:$0xff]  ;;  %v28_v17 = vld [vmem:[%s1535_s0 + $0x70] sm:$0xff]  ;;  %v29_v18 = vld [vmem:[%s1535_s0 + $0x78] sm:$0xff] }
   0x7   :  { %v1345_v19 = vld [vmem:[%s1536_s1] sm:$0xff]  ;;  %v1354_v25 = vld [vmem:[%s1536_s1 + $0x8] sm:$0xff]  ;;  %v228_v27 = vld [vmem:[%s1536_s1 + $0x10] sm:$0xff] }
   0x8   :  { %1113 = vmatmul.mubr.msk.f32.vlgmr.msra.gmra.mrb[0].mxu0 %vm32_vm0, %v15_v4  ;;  %1140 = vmatprep.mubr.msk.f32.mxu1 %vm32_vm0, %v1345_v19  ;;  %v229_v30 = vld [vmem:[%s1536_s1 + $0x18] sm:$0xff] }
   0x9   :  { %1115 = vmatprep.mubr.msk.f32.mxu0 %vm32_vm0, %v16_v5 }
   0xc   :  { %1116 = vmatmul.mubr.msk.f32.gmra.mrb[2].mxu0 %vm32_vm0, %v17_v6 }
   0xd   :  { %1118 = vmatprep.mubr.msk.f32.mxu0 %vm32_vm0, %v18_v7 }
  0x10   :  { %1119 = vmatmul.mubr.msk.f32.gmra.mrb[4].mxu0 %vm32_vm0, %v19_v8 }
  0x11   :  { %1121 = vmatprep.mubr.msk.f32.mxu0 %vm32_vm0, %v20_v9 }
  0x14   :  { %1122 = vmatmul.mubr.msk.f32.gmra.mrb[6].mxu0 %vm32_vm0, %v21_v10 }
  0x15   :  { %1124 = vmatprep.mubr.msk.f32.mxu0 %vm32_vm0, %v22_v11 }
  0x18   :  { %1125 = vmatmul.mubr.msk.f32.gmra.mrb[8].mxu0 %vm32_vm0, %v23_v12 }
  0x19   :  { %1127 = vmatprep.mubr.msk.f32.mxu0 %vm32_vm0, %v24_v13 }
  0x1c   :  { %1128 = vmatmul.mubr.msk.f32.gmra.mrb[10].mxu0 %vm32_vm0, %v25_v14 }
  0x1d   :  { %1130 = vmatprep.mubr.msk.f32.mxu0 %vm32_vm0, %v26_v15 }
  0x20   :  { %1131 = vmatmul.mubr.msk.f32.gmra.mrb[12].mxu0 %vm32_vm0, %v27_v16 }
  0x21   :  { %1133 = vmatprep.mubr.msk.f32.mxu0 %vm32_vm0, %v28_v17 }
  0x24   :  { %1134 = vmatmul.mubr.msk.f32.gmra.mrb[14].mxu0 %vm32_vm0, %v29_v18 }
  0x25   :  { %1180 = vmatprep.mubr.msk.f32.mxu0 %vm32_vm0, %v1345_v19 }
  0xdb   :  { %v1114_v20 = vpop.f32.mrb[0].mxu0 }
  0xdc   :  { %v147_v21 = vpop.f32.mrb[1].mxu0 }
  0xdd   :  { %v1220_v22 = vpack.c.bf16 %v1114_v20, %v147_v21 }
  0xdf   :  { %v1117_v23 = vpop.f32.mrb[2].mxu0  ;;  %1221 = vmatprep.subr.bf16.mxu1 %v1220_v22 }
  0xe0   :  { %v157_v24 = vpop.f32.mrb[3].mxu0  ;;  %1223 = vmatpush3.bf16.msra.mxu1 %v1220_v22 }
  0xe1   :  { %v1224_v26 = vpack.c.bf16 %v1117_v23, %v157_v24 }
  0xe3   :  { %v1120_v28 = vpop.f32.mrb[4].mxu0  ;;  %1141 = vmatmul.mubr.msk.f32.vlgmr.msra.gmra.mrb[0].mxu1 %vm32_vm0, %v1354_v25  ;;  %1225 = vmatprep.subr.bf16.mxu1 %v1224_v26 }
  0xe4   :  { %v167_v29 = vpop.f32.mrb[5].mxu0  ;;  %1227 = vmatpush3.bf16.msra.mxu1 %v1224_v26  ;;  %1143 = vmatprep.mubr.msk.f32.mxu1 %vm32_vm0, %v228_v27 }
  0xe5   :  { %v1228_v31 = vpack.c.bf16 %v1120_v28, %v167_v29 }
  0xe7   :  { %v1123_v32 = vpop.f32.mrb[6].mxu0  ;;  %1144 = vmatmul.mubr.msk.f32.gmra.mrb[2].mxu1 %vm32_vm0, %v229_v30  ;;  %1229 = vmatprep.subr.bf16.mxu1 %v1228_v31 }
  0xe8   :  { %v177_v33 = vpop.f32.mrb[7].mxu0  ;;  %1150 = vmatprep.mubr.msk.f32.mxu1 %vm32_vm0, %v1345_v19 }
  0xe9   :  { %v1232_v34 = vpack.c.bf16 %v1123_v32, %v177_v33 }
  0xeb   :  { %v1126_v35 = vpop.f32.mrb[8].mxu0  ;;  %1151 = vmatmul.mubr.msk.f32.vlgmr.msra.gmra.mrb[4].mxu1 %vm32_vm0, %v1354_v25 }
  0xec   :  { %1231 = vmatpush3.bf16.msra.mxu1 %v1228_v31  ;;  %v187_v36 = vpop.f32.mrb[9].mxu0  ;;  %1153 = vmatprep.mubr.msk.f32.mxu1 %vm32_vm0, %v228_v27 }
  0xed   :  { %v1236_v37 = vpack.c.bf16 %v1126_v35, %v187_v36  ;;  %1233 = vmatprep.subr.bf16.mxu1 %v1232_v34 }
  0xef   :  { %1154 = vmatmul.mubr.msk.f32.gmra.mrb[6].mxu1 %vm32_vm0, %v229_v30  ;;  %1237 = vmatprep.subr.bf16.mxu0 %v1236_v37  ;;  %v1129_v38 = vpop.f32.mrb[10].mxu0 }
  0xf0   :  { %1239 = vmatpush3.bf16.msra.mxu0 %v1236_v37  ;;  %1160 = vmatprep.mubr.msk.f32.mxu1 %vm32_vm0, %v1345_v19  ;;  %v197_v39 = vpop.f32.mrb[11].mxu0 }
  0xf1   :  { %v1240_v40 = vpack.c.bf16 %v1129_v38, %v197_v39 }
  0xf3   :  { %1161 = vmatmul.mubr.msk.f32.vlgmr.msra.gmra.mrb[8].mxu1 %vm32_vm0, %v1354_v25  ;;  %v1132_v41 = vpop.f32.mrb[12].mxu0  ;;  %1181 = vmatmul.mubr.msk.f32.vlgmr.msra.gmra.mrb[16].mxu0 %vm32_vm0, %v1354_v25 }
  0xf4   :  { %1235 = vmatpush3.bf16.msra.mxu1 %v1232_v34  ;;  %1163 = vmatprep.mubr.msk.f32.mxu1 %vm32_vm0, %v228_v27  ;;  %v207_v42 = vpop.f32.mrb[13].mxu0 }
  0xf5   :  { %1241 = vmatprep.subr.bf16.mxu1 %v1240_v40  ;;  %v1244_v43 = vpack.c.bf16 %v1132_v41, %v207_v42  ;;  %1183 = vmatprep.mubr.msk.f32.mxu0 %vm32_vm0, %v228_v27 }
  0xf7   :  { %1164 = vmatmul.mubr.msk.f32.gmra.mrb[10].mxu1 %vm32_vm0, %v229_v30  ;;  %v1135_v44 = vpop.f32.mrb[14].mxu0  ;;  %1245 = vmatprep.subr.bf16.mxu0 %v1244_v43 }
  0xf8   :  { %1170 = vmatprep.mubr.msk.f32.mxu1 %vm32_vm0, %v1345_v19  ;;  %v217_v45 = vpop.f32.mrb[15].mxu0  ;;  %1247 = vmatpush3.bf16.msra.mxu0 %v1244_v43 }
  0xf9   :  { %v1248_v46 = vpack.c.bf16 %v1135_v44, %v217_v45  ;;  %1184 = vmatmul.mubr.msk.f32.gmra.mrb[18].mxu0 %vm32_vm0, %v229_v30 }
  0xfa   :  { %1200 = vmatprep.mubr.msk.f32.mxu0 %vm32_vm0, %v1345_v19 }
  0xfb   :  { %1171 = vmatmul.mubr.msk.f32.vlgmr.msra.gmra.mrb[12].mxu1 %vm32_vm0, %v1354_v25 }
  0xfc   :  { %1243 = vmatpush3.bf16.msra.mxu1 %v1240_v40  ;;  %1173 = vmatprep.mubr.msk.f32.mxu1 %vm32_vm0, %v228_v27 }
  0xfd   :  { %1249 = vmatprep.subr.bf16.mxu1 %v1248_v46  ;;  %1201 = vmatmul.mubr.msk.f32.vlgmr.msra.gmra.mrb[20].mxu0 %vm32_vm0, %v1354_v25 }
  0xfe   :  { %1203 = vmatprep.mubr.msk.f32.mxu0 %vm32_vm0, %v228_v27 }
  0xff   :  { %1174 = vmatmul.mubr.msk.f32.gmra.mrb[14].mxu1 %vm32_vm0, %v229_v30 }
 0x100   :  { %1190 = vmatprep.mubr.msk.f32.mxu1 %vm32_vm0, %v1345_v19 }
 0x101   :  { %1204 = vmatmul.mubr.msk.f32.gmra.mrb[22].mxu0 %vm32_vm0, %v229_v30 }
 0x103   :  { %1191 = vmatmul.mubr.msk.f32.vlgmr.msra.gmra.mrb[16].mxu1 %vm32_vm0, %v1354_v25 }
 0x104   :  { %1251 = vmatpush3.bf16.msra.mxu1 %v1248_v46  ;;  %1193 = vmatprep.mubr.msk.f32.mxu1 %vm32_vm0, %v228_v27 }
 0x107   :  { %1194 = vmatmul.mubr.msk.f32.gmra.mrb[18].mxu1 %vm32_vm0, %v229_v30 }
 0x108   :  { %1210 = vmatprep.mubr.msk.f32.mxu1 %vm32_vm0, %v1345_v19 }
 0x10b   :  { %1211 = vmatmul.mubr.msk.f32.vlgmr.msra.gmra.mrb[20].mxu1 %vm32_vm0, %v1354_v25 }
 0x10c   :  { %1213 = vmatprep.mubr.msk.f32.mxu1 %vm32_vm0, %v228_v27 }
 0x10f   :  { %1214 = vmatmul.mubr.msk.f32.gmra.mrb[22].mxu1 %vm32_vm0, %v229_v30 }
 0x1b6   :  { %v1142_v47 = vpop.f32.mrb[0].mxu1 }
 0x1b7   :  { %329 = vst.msk [vmem:[%s1537_s3 + $0x8] sm:$0xff] %vm327_vm1, %v1142_v47  ;;  %v308_v48 = vpop.f32.mrb[1].mxu1 }
 0x1b8   :  { %328 = vst.msk [vmem:[%s1537_s3] sm:$0xff] %vm327_vm1, %v308_v48 }
 0x1ba   :  { %v1145_v49 = vpop.f32.mrb[2].mxu1 }
 0x1bb   :  { %331 = vst.msk [vmem:[%s1537_s3 + $0x18] sm:$0xff] %vm327_vm1, %v1145_v49  ;;  %v318_v50 = vpop.f32.mrb[3].mxu1 }
 0x1bc   :  { %330 = vst.msk [vmem:[%s1537_s3 + $0x10] sm:$0xff] %vm327_vm1, %v318_v50 }
 0x1be   :  { %v1152_v51 = vpop.f32.mrb[4].mxu1 }
 0x1bf   :  { %991 = vst.msk [vmem:[%s1537_s3 + $0x28] sm:$0xff] %vm327_vm1, %v1152_v51  ;;  %v398_v52 = vpop.f32.mrb[5].mxu1 }
 0x1c0   :  { %990 = vst.msk [vmem:[%s1537_s3 + $0x20] sm:$0xff] %vm327_vm1, %v398_v52 }
 0x1c2   :  { %v1155_v53 = vpop.f32.mrb[6].mxu1 }
 0x1c3   :  { %993 = vst.msk [vmem:[%s1537_s3 + $0x38] sm:$0xff] %vm327_vm1, %v1155_v53  ;;  %v408_v54 = vpop.f32.mrb[7].mxu1 }
 0x1c4   :  { %992 = vst.msk [vmem:[%s1537_s3 + $0x30] sm:$0xff] %vm327_vm1, %v408_v54 }
 0x1c6   :  { %v1162_v55 = vpop.f32.mrb[8].mxu1  ;;  %v1182_v56 = vpop.f32.mrb[16].mxu0 }
 0x1c7   :  { %999 = vst.msk [vmem:[%s1537_s3 + $0x48] sm:$0xff] %vm327_vm1, %v1162_v55  ;;  %v488_v57 = vpop.f32.mrb[9].mxu1  ;;  %1015 = vst.msk [vmem:[%s1537_s3 + $0x88] sm:$0xff] %vm327_vm1, %v1182_v56  ;;  %v668_v58 = vpop.f32.mrb[17].mxu0 }
 0x1c8   :  { %998 = vst.msk [vmem:[%s1537_s3 + $0x40] sm:$0xff] %vm327_vm1, %v488_v57  ;;  %1014 = vst.msk [vmem:[%s1537_s3 + $0x80] sm:$0xff] %vm327_vm1, %v668_v58 }
 0x1ca   :  { %v1165_v59 = vpop.f32.mrb[10].mxu1 }
 0x1cb   :  { %1001 = vst.msk [vmem:[%s1537_s3 + $0x58] sm:$0xff] %vm327_vm1, %v1165_v59  ;;  %v498_v60 = vpop.f32.mrb[11].mxu1 }
 0x1cc   :  { %1000 = vst.msk [vmem:[%s1537_s3 + $0x50] sm:$0xff] %vm327_vm1, %v498_v60  ;;  %v1185_v61 = vpop.f32.mrb[18].mxu0 }
 0x1cd   :  { %1017 = vst.msk [vmem:[%s1537_s3 + $0x98] sm:$0xff] %vm327_vm1, %v1185_v61  ;;  %v678_v62 = vpop.f32.mrb[19].mxu0 }
 0x1ce   :  { %v1172_v63 = vpop.f32.mrb[12].mxu1  ;;  %1016 = vst.msk [vmem:[%s1537_s3 + $0x90] sm:$0xff] %vm327_vm1, %v678_v62 }
 0x1cf   :  { %1007 = vst.msk [vmem:[%s1537_s3 + $0x68] sm:$0xff] %vm327_vm1, %v1172_v63  ;;  %v578_v0 = vpop.f32.mrb[13].mxu1 }
 0x1d0   :  { %1006 = vst.msk [vmem:[%s1537_s3 + $0x60] sm:$0xff] %vm327_vm1, %v578_v0  ;;  %v1202_v1 = vpop.f32.mrb[20].mxu0 }
 0x1d1   :  { %1031 = vst.msk [vmem:[%s1537_s3 + $0xc8] sm:$0xff] %vm327_vm1, %v1202_v1  ;;  %v848_v2 = vpop.f32.mrb[21].mxu0 }
 0x1d2   :  { %v1175_v3 = vpop.f32.mrb[14].mxu1  ;;  %1030 = vst.msk [vmem:[%s1537_s3 + $0xc0] sm:$0xff] %vm327_vm1, %v848_v2 }
 0x1d3   :  { %1009 = vst.msk [vmem:[%s1537_s3 + $0x78] sm:$0xff] %vm327_vm1, %v1175_v3  ;;  %v588_v4 = vpop.f32.mrb[15].mxu1 }
 0x1d4   :  { %1008 = vst.msk [vmem:[%s1537_s3 + $0x70] sm:$0xff] %vm327_vm1, %v588_v4  ;;  %v1205_v5 = vpop.f32.mrb[22].mxu0 }
 0x1d5   :  { %1033 = vst.msk [vmem:[%s1537_s3 + $0xd8] sm:$0xff] %vm327_vm1, %v1205_v5  ;;  %v858_v6 = vpop.f32.mrb[23].mxu0 }
 0x1d6   :  { %v1192_v7 = vpop.f32.mrb[16].mxu1  ;;  %1032 = vst.msk [vmem:[%s1537_s3 + $0xd0] sm:$0xff] %vm327_vm1, %v858_v6 }
 0x1d7   :  { %1023 = vst.msk [vmem:[%s1537_s3 + $0xa8] sm:$0xff] %vm327_vm1, %v1192_v7  ;;  %v758_v8 = vpop.f32.mrb[17].mxu1 }
 0x1d8   :  { %1022 = vst.msk [vmem:[%s1537_s3 + $0xa0] sm:$0xff] %vm327_vm1, %v758_v8 }
 0x1da   :  { %v1195_v9 = vpop.f32.mrb[18].mxu1 }
 0x1db   :  { %1025 = vst.msk [vmem:[%s1537_s3 + $0xb8] sm:$0xff] %vm327_vm1, %v1195_v9  ;;  %v768_v10 = vpop.f32.mrb[19].mxu1 }
 0x1dc   :  { %1024 = vst.msk [vmem:[%s1537_s3 + $0xb0] sm:$0xff] %vm327_vm1, %v768_v10 }
 0x1de   :  { %v1212_v11 = vpop.f32.mrb[20].mxu1 }
 0x1df   :  { %1039 = vst.msk [vmem:[%s1537_s3 + $0xe8] sm:$0xff] %vm327_vm1, %v1212_v11  ;;  %v938_v12 = vpop.f32.mrb[21].mxu1 }
 0x1e0   :  { %1038 = vst.msk [vmem:[%s1537_s3 + $0xe0] sm:$0xff] %vm327_vm1, %v938_v12 }
 0x1e2   :  { %v1215_v13 = vpop.f32.mrb[22].mxu1 }
 0x1e3   :  { %1041 = vst.msk [vmem:[%s1537_s3 + $0xf8] sm:$0xff] %vm327_vm1, %v1215_v13  ;;  %v948_v14 = vpop.f32.mrb[23].mxu1 }
 0x1e4   :  { %1040 = vst.msk [vmem:[%s1537_s3 + $0xf0] sm:$0xff] %vm327_vm1, %v948_v14 }

</bundles_post_ra>
